<compile_context>
chip_gen: v7x
topology: tpu7x:2x2x1
jax: 0.10.0
libtpu: 0.0.40
codegen_flags: <defaults>
</compile_context>

<pallas_src>
import functools

import jax
import jax.numpy as jnp
import numpy as np
from jax.experimental import pallas as pl
from jax.experimental.pallas import tpu as pltpu

_LANES = 128                      # lane width (batch tile granularity / slab width)
_SUBLANES = 8
_DEFAULT_MAX_BLOCK_BATCH = 16384  # rows per grid step cap (VMEM-safe on v5e/v6e/v7x)


def _round_up(x, m):
    return (x + m - 1) // m * m


def _cdiv(a, b):
    return -(-a // b)


# --------------------------------------------------------------------------- #
# Kernel (batch-in-lanes layout)
# --------------------------------------------------------------------------- #
def _mlp_kernel(x_ref, p_ref, o_ref, *, din, hidden, out_pad,
                w1t_off, b1_off, w2t_off, b2_off, w3t_off, b3_off):
    x = x_ref[...]                                            # (din, TB) f32

    # ---- layer 1: K == din (tiny) -> VPU outer-product FMA, skip the MXU.
    w1t = p_ref[w1t_off:w1t_off + hidden, 0:din]              # (hidden, din)
    h = p_ref[b1_off:b1_off + hidden, 0:1] + w1t[:, 0:1] * x[0:1, :]
    for k in range(1, din):                                   # static unroll (din small)
        h = h + w1t[:, k:k + 1] * x[k:k + 1, :]
    h = jnp.maximum(h, 0.0)                                   # (hidden, TB)

    # ---- layer 2: hidden x hidden on the MXU.
    h = jnp.dot(p_ref[w2t_off:w2t_off + hidden, 0:hidden], h,
                preferred_element_type=jnp.float32)
    h = jnp.maximum(h + p_ref[b2_off:b2_off + hidden, 0:1], 0.0)

    # ---- layer 3: only out_pad (=8) rows -> narrow bias/sigmoid + narrow store.
    logits = jnp.dot(p_ref[w3t_off:w3t_off + out_pad, 0:hidden], h,
                     preferred_element_type=jnp.float32)
    logits = logits + p_ref[b3_off:b3_off + out_pad, 0:1]
    o_ref[...] = jax.nn.sigmoid(logits)                       # (out_pad, TB)


# --------------------------------------------------------------------------- #
# Parameter packing (done ONCE, outside the per-call path)
# --------------------------------------------------------------------------- #
def pack_params(params):
    """Pack transposed (w1,b1,w2,b2,w3,b3) into one sublane-aligned (R,128) slab."""
    w1, b1 = params["w1"], params["b1"]
    w2, b2 = params["w2"], params["b2"]
    w3, b3 = params["w3"], params["b3"]
    din, hidden = w1.shape
    out_dim = w3.shape[1]
    assert hidden <= _LANES and din <= _LANES and out_dim <= _LANES

    out_pad = _round_up(out_dim, _SUBLANES)
    hid_rows = _round_up(hidden, _SUBLANES)
    out_rows = _round_up(out_pad, _SUBLANES)

    w1t_off = 0
    b1_off = w1t_off + hid_rows
    w2t_off = b1_off + hid_rows
    b2_off = w2t_off + hid_rows
    w3t_off = b2_off + hid_rows
    b3_off = w3t_off + out_rows
    rows = _round_up(b3_off + out_rows, _SUBLANES)

    slab = jnp.zeros((rows, _LANES), jnp.float32)
    slab = slab.at[w1t_off:w1t_off + hidden, 0:din].set(jnp.asarray(w1, jnp.float32).T)
    slab = slab.at[b1_off:b1_off + hidden, 0].set(jnp.asarray(b1, jnp.float32).reshape(-1))
    slab = slab.at[w2t_off:w2t_off + hidden, 0:hidden].set(jnp.asarray(w2, jnp.float32).T)
    slab = slab.at[b2_off:b2_off + hidden, 0].set(jnp.asarray(b2, jnp.float32).reshape(-1))
    slab = slab.at[w3t_off:w3t_off + out_dim, 0:hidden].set(jnp.asarray(w3, jnp.float32).T)
    slab = slab.at[b3_off:b3_off + out_dim, 0].set(jnp.asarray(b3, jnp.float32).reshape(-1))

    cfg = dict(din=din, hidden=hidden, out_dim=out_dim, out_pad=out_pad,
               w1t_off=w1t_off, b1_off=b1_off, w2t_off=w2t_off,
               b2_off=b2_off, w3t_off=w3t_off, b3_off=b3_off)
    return slab, cfg


# --------------------------------------------------------------------------- #
# Tile selection (minimal padding, >=2 grid steps for v7x megacore)
# --------------------------------------------------------------------------- #
def _choose_tile(batch, block_batch=None, max_block_batch=_DEFAULT_MAX_BLOCK_BATCH):
    bp_min = _round_up(max(batch, 1), _LANES)
    if block_batch is not None:
        tb = _round_up(block_batch, _LANES)
    else:
        n_steps = max(1, _cdiv(bp_min, max_block_batch))
        if bp_min > _LANES:
            n_steps = max(n_steps, 2)          # use both TensorCores on v7x
        tb = _round_up(_cdiv(bp_min, n_steps), _LANES)
    tb = min(tb, bp_min)
    n_steps = _cdiv(bp_min, tb)
    return tb, n_steps * tb


# --------------------------------------------------------------------------- #
# Forward
# --------------------------------------------------------------------------- #
def _forward_impl(x, slab, *, cfg, block_batch=None):
    din, out_dim, out_pad = cfg["din"], cfg["out_dim"], cfg["out_pad"]
    B = x.shape[0]
    assert x.shape[1] == din

    tb, bp = _choose_tile(B, block_batch)

    # batch-in-lanes: (din, bp), zero-padded along batch
    xt = jnp.pad(jnp.asarray(x, jnp.float32).T, ((0, 0), (0, bp - B)))

    kernel = functools.partial(
        _mlp_kernel,
        din=din, hidden=cfg["hidden"], out_pad=out_pad,
        w1t_off=cfg["w1t_off"], b1_off=cfg["b1_off"],
        w2t_off=cfg["w2t_off"], b2_off=cfg["b2_off"],
        w3t_off=cfg["w3t_off"], b3_off=cfg["b3_off"])

    out_t = pl.pallas_call(
        kernel,
        out_shape=jax.ShapeDtypeStruct((out_pad, bp), jnp.float32),
        grid_spec=pltpu.PrefetchScalarGridSpec(
            num_scalar_prefetch=0,
            grid=(bp // tb,),
            in_specs=[
                pl.BlockSpec((din, tb), lambda i: (0, i)),     # batch-tiled x (lanes)
                pl.BlockSpec(slab.shape, lambda i: (0, 0)),    # weights stay resident
            ],
            out_specs=pl.BlockSpec((out_pad, tb), lambda i: (0, i)),
        ),
        compiler_params=pltpu.CompilerParams(
            dimension_semantics=("parallel",),                 # shard steps across TCs
            vmem_limit_bytes=32 * 1024 * 1024,                 # safe on v7x's 64 MiB VMEM
        ),
    )(xt, slab)

    return out_t[:out_dim, :B].T                               # (B, out_dim)


def make_generator(params, *, block_batch=None):
    """Pack params once, return a jitted forward: x [B, din] -> [B, out_dim]."""
    slab, cfg = pack_params(params)

    @jax.jit
    def forward(x, slab_):
        return _forward_impl(x, slab_, cfg=cfg, block_batch=block_batch)

    return lambda x: forward(x, slab)


def generator_forward(x, params, *, block_batch=None):
    """One-shot convenience (re-packs params each call; prefer make_generator)."""
    slab, cfg = pack_params(params)
    return _forward_impl(x, slab, cfg=cfg, block_batch=block_batch)


# --------------------------------------------------------------------------- #
# Init + reference
# --------------------------------------------------------------------------- #
def init_params(key, input_dim=2, hidden=16, out_dim=2):
    """Deterministic init mimicking nn.Linear's U(-1/sqrt(fan_in), 1/sqrt(fan_in))."""
    ks = jax.random.split(key, 6)

    def linear(kw, kb, fan_in, fan_out):
        bound = 1.0 / np.sqrt(fan_in)
        w = jax.random.uniform(kw, (fan_in, fan_out), jnp.float32, -bound, bound)
        b = jax.random.uniform(kb, (1, fan_out), jnp.float32, -bound, bound)
        return w, b

    w1, b1 = linear(ks[0], ks[1], input_dim, hidden)
    w2, b2 = linear(ks[2], ks[3], hidden, hidden)
    w3, b3 = linear(ks[4], ks[5], hidden, out_dim)
    return {"w1": w1, "b1": b1, "w2": w2, "b2": b2, "w3": w3, "b3": b3}


def _reference_forward(x, p):
    h1 = jnp.maximum(x @ p["w1"] + p["b1"], 0.0)
    h2 = jnp.maximum(h1 @ p["w2"] + p["b2"], 0.0)
    return jax.nn.sigmoid(h2 @ p["w3"] + p["b3"])


if __name__ == "__main__":
    key = jax.random.PRNGKey(0)
    k_x, k_x2, k_p = jax.random.split(key, 3)

    B, input_dim, hidden, out_dim = 8, 2, 16, 2
    params = init_params(k_p, input_dim=input_dim, hidden=hidden, out_dim=out_dim)
    fwd = make_generator(params)

    # single-tile path (B=8 -> one 128-lane tile)
    x = jax.random.normal(k_x, (B, input_dim), jnp.float32)
    out = jax.block_until_ready(fwd(x))
    ref = _reference_forward(x, params)
    np.testing.assert_allclose(np.asarray(out), np.asarray(ref), rtol=1e-4, atol=1e-5)

    # multi-step grid + lane-padding path (B=200 -> two 128-wide tiles)
    B2 = 200
    x2 = jax.random.normal(k_x2, (B2, input_dim), jnp.float32)
    out2 = jax.block_until_ready(fwd(x2))
    ref2 = _reference_forward(x2, params)
    np.testing.assert_allclose(np.asarray(out2), np.asarray(ref2), rtol=1e-4, atol=1e-5)

    # explicit tile override (exercises the block_batch knob / pipeline)
    fwd_tiled = make_generator(params, block_batch=128)
    out3 = jax.block_until_ready(fwd_tiled(x2))
    np.testing.assert_allclose(np.asarray(out3), np.asarray(ref2), rtol=1e-4, atol=1e-5)

    print("KERNEL_OK")
</pallas_src>

<mosaic_0001>
module attributes {stable_mosaic.version = 11 : i64} {
  func.func @_mlp_kernel(%arg0: i32, %arg1: memref<2x128xf32, #tpu.memory_space<vmem>>, %arg2: memref<80x128xf32, #tpu.memory_space<vmem>>, %arg3: memref<8x128xf32, #tpu.memory_space<vmem>>) attributes {dimension_semantics = [#tpu.dimension_semantics<parallel>], iteration_bounds = array<i64: 1>, scalar_prefetch = 0 : i64, scratch_operands = 0 : i64, tpu.core_type = #tpu.core_type<tc>, window_params = [{transform_indices = @transform_0, window_bounds = array<i64: 2, 128>}, {pipeline_mode = #tpu.pipeline_mode<synchronous>, transform_indices = @transform_1, window_bounds = array<i64: 80, 128>}, {transform_indices = @transform_2, window_bounds = array<i64: 8, 128>}]} {
    %c0 = arith.constant 0 : index
    %c0_0 = arith.constant 0 : index
    %0 = vector.load %arg1[%c0, %c0_0] : memref<2x128xf32, #tpu.memory_space<vmem>>, vector<2x128xf32>
    %c0_1 = arith.constant 0 : index
    %c0_2 = arith.constant 0 : index
    %1 = vector.load %arg2[%c0_1, %c0_2] : memref<80x128xf32, #tpu.memory_space<vmem>>, vector<16x2xf32>
    %c16 = arith.constant 16 : index
    %c0_3 = arith.constant 0 : index
    %2 = vector.load %arg2[%c16, %c0_3] : memref<80x128xf32, #tpu.memory_space<vmem>>, vector<16x1xf32>
    %3 = vector.extract_strided_slice %1 {offsets = [0, 0], sizes = [16, 1], strides = [1, 1]} : vector<16x2xf32> to vector<16x1xf32>
    %4 = vector.extract_strided_slice %0 {offsets = [0, 0], sizes = [1, 128], strides = [1, 1]} : vector<2x128xf32> to vector<1x128xf32>
    %5 = vector.broadcast %3 : vector<16x1xf32> to vector<16x128xf32>
    %6 = vector.broadcast %4 : vector<1x128xf32> to vector<16x128xf32>
    %7 = arith.mulf %5, %6 : vector<16x128xf32>
    %8 = vector.broadcast %2 : vector<16x1xf32> to vector<16x128xf32>
    %9 = arith.addf %8, %7 : vector<16x128xf32>
    %10 = vector.extract_strided_slice %1 {offsets = [0, 1], sizes = [16, 1], strides = [1, 1]} : vector<16x2xf32> to vector<16x1xf32>
    %11 = vector.extract_strided_slice %0 {offsets = [1, 0], sizes = [1, 128], strides = [1, 1]} : vector<2x128xf32> to vector<1x128xf32>
    %12 = vector.broadcast %10 : vector<16x1xf32> to vector<16x128xf32>
    %13 = vector.broadcast %11 : vector<1x128xf32> to vector<16x128xf32>
    %14 = arith.mulf %12, %13 : vector<16x128xf32>
    %15 = arith.addf %9, %14 : vector<16x128xf32>
    %cst = arith.constant 0.000000e+00 : f32
    %16 = vector.broadcast %cst : f32 to vector<16x128xf32>
    %17 = arith.maximumf %15, %16 : vector<16x128xf32>
    %c32 = arith.constant 32 : index
    %c0_4 = arith.constant 0 : index
    %18 = vector.load %arg2[%c32, %c0_4] : memref<80x128xf32, #tpu.memory_space<vmem>>, vector<16x16xf32>
    %cst_5 = arith.constant dense<0.000000e+00> : vector<16x128xf32>
    %19 = tpu.matmul %18, %17, %cst_5 {dimension_numbers = #tpu.dot_dimension_numbers<[1], [0], [0], [1], [0, 0, 1, 1], [], []>} : vector<16x16xf32>, vector<16x128xf32>, vector<16x128xf32> -> vector<16x128xf32>
    %c48 = arith.constant 48 : index
    %c0_6 = arith.constant 0 : index
    %20 = vector.load %arg2[%c48, %c0_6] : memref<80x128xf32, #tpu.memory_space<vmem>>, vector<16x1xf32>
    %21 = vector.broadcast %20 : vector<16x1xf32> to vector<16x128xf32>
    %22 = arith.addf %19, %21 : vector<16x128xf32>
    %cst_7 = arith.constant 0.000000e+00 : f32
    %23 = vector.broadcast %cst_7 : f32 to vector<16x128xf32>
    %24 = arith.maximumf %22, %23 : vector<16x128xf32>
    %c64 = arith.constant 64 : index
    %c0_8 = arith.constant 0 : index
    %25 = vector.load %arg2[%c64, %c0_8] : memref<80x128xf32, #tpu.memory_space<vmem>>, vector<8x16xf32>
    %cst_9 = arith.constant dense<0.000000e+00> : vector<8x128xf32>
    %26 = tpu.matmul %25, %24, %cst_9 {dimension_numbers = #tpu.dot_dimension_numbers<[1], [0], [0], [1], [0, 0, 1, 1], [], []>} : vector<8x16xf32>, vector<16x128xf32>, vector<8x128xf32> -> vector<8x128xf32>
    %c72 = arith.constant 72 : index
    %c0_10 = arith.constant 0 : index
    %27 = vector.load %arg2[%c72, %c0_10] : memref<80x128xf32, #tpu.memory_space<vmem>>, vector<8x1xf32>
    %28 = vector.broadcast %27 : vector<8x1xf32> to vector<8x128xf32>
    %29 = arith.addf %26, %28 : vector<8x128xf32>
    %30 = arith.negf %29 : vector<8x128xf32>
    %31 = math.exp %30 : vector<8x128xf32>
    %cst_11 = arith.constant 1.000000e+00 : f32
    %32 = vector.broadcast %cst_11 : f32 to vector<8x128xf32>
    %33 = arith.addf %32, %31 : vector<8x128xf32>
    %34 = arith.divf %32, %33 : vector<8x128xf32>
    %c0_12 = arith.constant 0 : index
    %c0_13 = arith.constant 0 : index
    %35 = vector.load %arg3[%c0_12, %c0_13] : memref<8x128xf32, #tpu.memory_space<vmem>>, vector<8x128xf32>
    tpu.vector_store %arg3[%c0_12, %c0_13], %34 {strides = array<i32>} : memref<8x128xf32, #tpu.memory_space<vmem>>, vector<8x128xf32>,
    return
  }
  func.func @transform_0(%arg0: i32) -> (i32, i32) {
    %c0_i32 = arith.constant 0 : i32
    %c0_i32_0 = arith.constant 0 : i32
    return %c0_i32, %arg0 : i32, i32
  }
  func.func @transform_1(%arg0: i32) -> (i32, i32) {
    %c0_i32 = arith.constant 0 : i32
    %c0_i32_0 = arith.constant 0 : i32
    %c0_i32_1 = arith.constant 0 : i32
    return %c0_i32, %c0_i32_0 : i32, i32
  }
  func.func @transform_2(%arg0: i32) -> (i32, i32) {
    %c0_i32 = arith.constant 0 : i32
    %c0_i32_0 = arith.constant 0 : i32
    return %c0_i32, %arg0 : i32, i32
  }
}

</mosaic_0001>

<bundles_post_ra>
// kernel: forward.1
= control target key start
LH: loop header
LB: loop body
LE: loop exit
PB: predicated region body
PF: predicated region fallthrough
CT: control target
= control target key end

     0   :  { %7 = vsyncpa [#allocation3], 0  ;;  %s340_s9 = smov [#allocation2]   ;;  %s384_s0 = inlined_call_operand.vmem [shape: f32[2,128], index: 0, kind: input, shape index: {}]   ;;  %s385_s1 = inlined_call_operand.hbm [shape: f32[80,128], index: 1, kind: input, shape index: {}]   ;;  %s386_s2 = inlined_call_operand.vmem [shape: f32[8,128], index: 2, kind: output, shape index: {}]  }
   0x1   :  { %s15_s10 = sshll.u32 %s340_s9, 4  ;;  %s316_s13 = scalar_lea.hbm %s385_s1, 1280  ;;  %s16_s10 = int_to_ptr.vmem [resolvable:$true] %s15_s10 }
   0x2   :  { %p317_p0 = scmp.ne.s32.totalorder %s385_s1, %s316_s13  ;;  %p320_p1 = scmp.lt.u32.totalorder %s316_s13, %s385_s1 }
   0x4   :  { %p322_p2 = pnand %p320_p1, %p317_p0 }
   0x6   :  { %325 = shalt.err (!%p322_p2)
}
   0x7   :  { %s326_s18 = scalar_lea.vmem %s16_s10, 1280  ;;  %p331_p4 = scmp.lt.s32.totalorder %s16_s10, %s16_s10 }
   0x8   :  { %p327_p3 = scmp.ne.s32.totalorder %s16_s10, %s326_s18  ;;  %p332_p5 = scmp.lt.s32.totalorder %s326_s18, %s326_s18 }
   0xa   :  { %p333_p6 = por %p332_p5, %p331_p4 }
   0xc   :  { %p334_p7 = pnand %p333_p6, %p327_p3 }
   0xe   :  { %337 = shalt.err (!%p334_p7)
}
   0xf   :  { %s341_s19 = smov 128   ;;  %s342_s20 = smov 8  }
  0x10   :  { %21 = dma.hbm_to_vmem [thread:$0]  %s385_s1, 1280, %s16_s10, [#allocation3], %s341_s19, %s341_s19, %s342_s20  }
  0x11   :  { %338 = dma.done.wait [#allocation3], 1280  }
  0x12   :  { %339 = vsyncadd [#allocation3], 4294966016  ;;  %v343_v0 = vmov 0   ;;  %v28_v1 = vld [vmem:[#allocation2 + $0x10] sm:$0xff]  ;;  %v26_v2 = vld [vmem:[#allocation2] sm:$0xff]  ;;  %v344_v5 = vmov 1   ;;  %v40_v10 = vlaneseq }
  0x13   :  { %307 = vset.pattern.permute.xlu1 %v343_v0  ;;  %306 = vset.pattern.permute.xlu0 %v343_v0  ;;  %v29_v3 = vld [vmem:[#allocation2 + $0x18] sm:$0xff]  ;;  %v27_v4 = vld [vmem:[#allocation2 + $0x8] sm:$0xff]  ;;  %v76_v6 = vld [vmem:[#allocation2 + $0x20] sm:$0xff]  ;;  %vm90_vm0 = vcmask 130048   ;;  %v345_v35 = vmov 0.0|0.0   ;;  %vm346_vm1 = vmmov 0  }
  0x14   :  { %48 = vperm.xlu1 %307, %v28_v1   ;;  %32 = vperm.xlu0 %306, %v26_v2   ;;  %v78_v7 = vld [vmem:[#allocation2 + $0x30] sm:$0xff]  ;;  %v79_v8 = vld [vmem:[#allocation2 + $0x38] sm:$0xff]  ;;  %v175_v9 = vld [vmem:[#allocation2 + $0x48] sm:$0xff]  ;;  %v41_v11 = vshrl.u32 %v40_v10, 7  ;;  %v347_v36 = vmov 0.0  }
  0x15   :  { %281 = vmatprep.mubr.msk.f32.mxu0 %vm90_vm0, %v76_v6  ;;  %v25_v13 = vld [vmem:[%s384_s0] sm:$0x3]  ;;  %v77_v34 = vld [vmem:[#allocation2 + $0x28] sm:$0xff]  ;;  %295 = vmatprep.subr.bf16.mxu1 %v345_v35 }
  0x16   :  { %v42_v12 = vsub.s32 0, %v41_v11  ;;  %v68_v17 = vsub.s32 1, %v41_v11  ;;  %288 = vmatprep.mubr.msk.f32.mxu1 %vm346_vm1, %v347_v36  ;;  %v174_v46 = vld [vmem:[#allocation2 + $0x40] sm:$0xff] }
  0x18   :  { %53 = vperm.xlu1 %307, %v29_v3   ;;  %37 = vperm.xlu0 %306, %v27_v4   ;;  %v43_v16 = vrot.slane %v25_v13, %v42_v12  ;;  %v69_v22 = vrot.slane %v25_v13, %v68_v17 }
  0x1c   :  { %309 = vset.pattern.permute.xlu1 %v344_v5  ;;  %308 = vset.pattern.permute.xlu0 %v344_v5 }
  0x1d   :  { %63 = vperm.xlu1 %309, %v27_v4   ;;  %59 = vperm.xlu0 %308, %v26_v2  }
  0x21   :  { %310 = vset.pattern.permute.xlu1 %v343_v0  ;;  %311 = vset.pattern.permute.xlu0 %v343_v0 }
  0x22   :  { %82 = vperm.xlu1 %310, %v78_v7   ;;  %87 = vperm.xlu0 %311, %v79_v8  }
  0x26   :  { %178 = vperm.xlu1 %310, %v175_v9  }
  0x93   :  { %v49_v14 = vpop.permute.xlu1 %48  ;;  %v33_v15 = vpop.permute.xlu0 %32 }
  0x94   :  { %v44_v20 = vmul.f32 %v43_v16, %v33_v15 }
  0x96   :  { %v56_v25 = vadd.f32 %v49_v14, %v44_v20 }
  0x97   :  { %v54_v18 = vpop.permute.xlu1 %53  ;;  %v38_v19 = vpop.permute.xlu0 %37 }
  0x98   :  { %v45_v21 = vmul.f32 %v43_v16, %v38_v19 }
  0x9a   :  { %v57_v26 = vadd.f32 %v54_v18, %v45_v21 }
  0x9c   :  { %v64_v23 = vpop.permute.xlu1 %63  ;;  %v60_v24 = vpop.permute.xlu0 %59 }
  0x9d   :  { %v71_v27 = vmul.f32 %v69_v22, %v64_v23  ;;  %v70_v28 = vmul.f32 %v69_v22, %v60_v24 }
  0x9f   :  { %v73_v29 = vadd.f32 %v71_v27, %v57_v26  ;;  %v72_v30 = vadd.f32 %v70_v28, %v56_v25 }
  0xa1   :  { %v75_v31 = vmax.f32 %v73_v29, 0.0  ;;  %v74_v32 = vmax.f32 %v72_v30, 0.0  ;;  %v88_v37 = vpop.permute.xlu0 %87  ;;  %v83_v39 = vpop.permute.xlu1 %82 }
  0xa3   :  { %v291_v33 = vpack.c.bf16 %v75_v31, %v74_v32 }
  0xa5   :  { %292 = vmatprep.subr.bf16.mxu0 %v291_v33  ;;  %v179_v47 = vpop.permute.xlu1 %178 }
  0xa6   :  { %294 = vmatpush3.bf16.msra.mxu0 %v291_v33 }
  0xa9   :  { %282 = vmatmul.mubr.msk.f32.vlgmr.msra.gmra.mrb[0].mxu0 %vm90_vm0, %v77_v34 }
 0x17c   :  { %v283_v38 = vpop.f32.mrb[0].mxu0 }
 0x17d   :  { %v169_v40 = vadd.f32 %v283_v38, %v88_v37  ;;  %v163_v41 = vpop.f32.mrb[1].mxu0 }
 0x17e   :  { %v164_v42 = vadd.f32 %v163_v41, %v83_v39 }
 0x17f   :  { %v173_v43 = vmax.f32 %v169_v40, 0.0 }
 0x180   :  { %v172_v44 = vmax.f32 %v164_v42, 0.0 }
 0x182   :  { %v296_v45 = vpack.c.bf16 %v173_v43, %v172_v44 }
 0x184   :  { %297 = vmatpush3.bf16.msra.mxu1 %v296_v45 }
 0x187   :  { %289 = vmatmul.mubr.msk.f32.vlgmr.msra.gmra.mrb[0].mxu1 %vm90_vm0, %v174_v46 }
 0x25a   :  { %v250_v48 = vpop.f32.mrb[0].mxu1 }
 0x25b   :  { %v251_v49 = vadd.f32 %v250_v48, %v179_v47  ;;  %v290_v50 = vpop.f32.mrb[1].mxu1 }
 0x25d   :  { %v269_v51 = vmul.f32 -1.442695, %v251_v49 }
 0x25f   :  { %312 = vpow2.f32 %v269_v51 }
 0x269   :  { %v313_v52 = vpop.eup %312 }
 0x26a   :  { %v257_v53 = vadd.f32 1.0, %v313_v52 }
 0x26c   :  { %314 = vrcp.f32 %v257_v53 }
 0x276   :  { %v315_v54 = vpop.eup %314 }
 0x277   :  { %260 = vst [vmem:[%s386_s2] sm:$0xff] %v315_v54 }
 0x278   :  { %265 = vsyncpa [#allocation3], 1 }

</bundles_post_ra>
